<compile_context>
chip_gen: v7x
topology: tpu7x:2x2x1
jax: 0.10.0
libtpu: 0.0.40
codegen_flags: <defaults>
</compile_context>

<pallas_src>
import functools

import jax
import jax.numpy as jnp
from jax.experimental import pallas as pl
from jax.experimental.pallas import tpu as pltpu

# ---- model hyper-params (consistent with the module) -----------------------
FEATURE_DIM = 512        # `feature_dim` global in the original code
HIDDEN1 = 256
HIDDEN2 = 128
OUTPUT_DIM = 101         # number of score bins (USDL-style)
LANE = 128

_NEG_BIG = -1e30         # "minus infinity" for padded logit columns (finite -> no NaN risk)
_TILE_CAP = 2048         # max rows per grid step (keeps VMEM modest on v7x's 64 MiB)


# ---------------------------------------------------------------------------
# Kernel: one batch tile of the MLP + softmax; all operands VMEM-resident.
# ---------------------------------------------------------------------------
def _mlp_evaluator_kernel(x_ref, w1_ref, b1_ref, w2_ref, b2_ref,
                          w3_ref, b3_ref, out_ref):
    # In-kernel f32 -> bf16 cast (saves a separate wrapper HBM pass over x);
    # the VPU cast hides under MXU / DMA.
    x = x_ref[...].astype(jnp.bfloat16)                             # (TM, F)

    # layer1 + ReLU  (MXU in bf16, accumulate f32, elementwise in f32)
    h1 = jnp.dot(x, w1_ref[...], preferred_element_type=jnp.float32)
    h1 = jnp.maximum(h1 + b1_ref[...], 0.0).astype(jnp.bfloat16)    # (TM, 256)

    # layer2 + ReLU
    h2 = jnp.dot(h1, w2_ref[...], preferred_element_type=jnp.float32)
    h2 = jnp.maximum(h2 + b2_ref[...], 0.0).astype(jnp.bfloat16)    # (TM, 128)

    # layer3 + softmax over the (padded) lane dim.  Padded cols: w3=0, b3=-1e30
    # -> logits = -1e30 -> exp underflows to exactly 0 in f32, so softmax over
    # 128 lanes equals softmax over the real `output_dim` logits.
    logits = jnp.dot(h2, w3_ref[...], preferred_element_type=jnp.float32)
    logits = logits + b3_ref[...]                                   # (TM, 128) f32

    m = jnp.max(logits, axis=-1, keepdims=True)
    e = jnp.exp(logits - m)
    denom = jnp.sum(e, axis=-1, keepdims=True)
    out_ref[...] = (e / denom).astype(out_ref.dtype)                # exact normalization


# ---------------------------------------------------------------------------
# One-time weight preparation (hoisted out of the per-call hot path).
# ---------------------------------------------------------------------------
def prepare_params(params):
    """bf16-cast weights and pad layer-3 to a lane-dense width. Call once, reuse."""
    w1, b1, w2, b2, w3, b3 = params
    out_dim = w3.shape[1]
    out_pad = max(LANE, pl.cdiv(out_dim, LANE) * LANE)

    w1b = w1.astype(jnp.bfloat16)
    w2b = w2.astype(jnp.bfloat16)
    w3p = jnp.pad(w3, ((0, 0), (0, out_pad - out_dim))).astype(jnp.bfloat16)
    b3p = jnp.pad(b3.astype(jnp.float32), ((0, 0), (0, out_pad - out_dim)),
                  constant_values=_NEG_BIG)
    return (w1b, b1.astype(jnp.float32), w2b, b2.astype(jnp.float32), w3p, b3p)


def _choose_batch_tile(batch):
    """Pick (tile_rows, num_tiles). Big tiles amortize the ~0.35us/step cost;
    >=2 tiles when the batch is large so v7x's 2 TensorCores both get work."""
    bp = ((batch + 7) // 8) * 8                       # sublane-align
    if bp <= 256:
        return bp, 1                                  # tiny batch: single tile
    n = max(2, pl.cdiv(bp, _TILE_CAP))                # >=2 tiles, each <= cap
    tile = pl.cdiv(pl.cdiv(bp, n), LANE) * LANE       # 128-row aligned tiles
    return tile, pl.cdiv(bp, tile)


# ---------------------------------------------------------------------------
# Forward wrapper (hot path): pad batch, launch kernel, slice real outputs.
# ---------------------------------------------------------------------------
def evaluator_forward(feats_avg, prepared_params, *, output_dim=OUTPUT_DIM):
    """USDL-CoSL Evaluator forward. feats_avg: (B, F) float32 -> (B, output_dim)."""
    w1b, b1, w2b, b2, w3p, b3p = prepared_params
    batch, feat = feats_avg.shape
    h1 = w1b.shape[1]
    h2 = w2b.shape[1]
    out_pad = w3p.shape[1]

    tile, num_tiles = _choose_batch_tile(batch)
    bp = tile * num_tiles

    x = feats_avg.astype(jnp.float32)                 # kernel casts to bf16 internally
    if bp != batch:
        x = jnp.pad(x, ((0, bp - batch), (0, 0)))

    # Batch-tiled specs for activations; grid-invariant specs for weights/biases
    # (same block every step -> weights DMA'd once, stay VMEM-resident).
    x_spec = pl.BlockSpec((tile, feat), lambda i: (i, 0))
    out_spec = pl.BlockSpec((tile, out_pad), lambda i: (i, 0))
    const = lambda shape: pl.BlockSpec(shape, lambda i: (0, 0))

    flops = 2 * bp * (feat * h1 + h1 * h2 + h2 * out_pad)
    bytes_accessed = (
        bp * feat * 4                                        # x (f32)
        + (feat * h1 + h1 * h2 + h2 * out_pad) * 2           # weights (bf16)
        + (h1 + h2 + out_pad) * 4                            # biases (f32)
        + bp * out_pad * 4                                   # output (f32)
    )
    cost = pl.CostEstimate(flops=flops,
                           transcendentals=bp * out_pad,
                           bytes_accessed=bytes_accessed)

    out = pl.pallas_call(
        _mlp_evaluator_kernel,
        out_shape=jax.ShapeDtypeStruct((bp, out_pad), jnp.float32),
        grid=(num_tiles,),
        in_specs=[
            x_spec,
            const((feat, h1)), const((1, h1)),
            const((h1, h2)),   const((1, h2)),
            const((h2, out_pad)), const((1, out_pad)),
        ],
        out_specs=out_spec,
        compiler_params=pltpu.CompilerParams(
            dimension_semantics=("parallel",),   # shard batch tiles across TCs on v7x
            vmem_limit_bytes=32 << 20,
        ),
        cost_estimate=cost,
    )(x, w1b, b1, w2b, b2, w3p, b3p)

    return out[:batch, :output_dim]


# ---------------------------------------------------------------------------
# Init + pure-JAX reference + self-test.
# ---------------------------------------------------------------------------
def init_params(key, *, feature_dim=FEATURE_DIM, output_dim=OUTPUT_DIM):
    """Deterministic init matching nn.Linear shapes (stored transposed: (in, out))."""
    def linear(key, fan_in, fan_out):
        kw, kb = jax.random.split(key)
        bound = 1.0 / jnp.sqrt(fan_in)
        w = jax.random.uniform(kw, (fan_in, fan_out), jnp.float32, -bound, bound)
        b = jax.random.uniform(kb, (1, fan_out), jnp.float32, -bound, bound)
        return w, b

    k1, k2, k3 = jax.random.split(key, 3)
    w1, b1 = linear(k1, feature_dim, HIDDEN1)
    w2, b2 = linear(k2, HIDDEN1, HIDDEN2)
    w3, b3 = linear(k3, HIDDEN2, output_dim)
    return (w1, b1, w2, b2, w3, b3)


def reference_forward(feats_avg, params):
    """Pure-JAX f32 reference of the PyTorch module semantics."""
    w1, b1, w2, b2, w3, b3 = params
    h1 = jnp.maximum(feats_avg @ w1 + b1, 0.0)
    h2 = jnp.maximum(h1 @ w2 + b2, 0.0)
    return jax.nn.softmax(h2 @ w3 + b3, axis=-1)


# TODO(synk): the 'MUSDL-CoSL' branch (ModuleList of judges) is just this same
# kernel called once per judge with that judge's prepared params.

if __name__ == "__main__":
    key = jax.random.PRNGKey(0)
    k_params, k_x = jax.random.split(key)

    BATCH = 8                                            # small example batch
    params = init_params(k_params)
    prepared = prepare_params(params)                    # one-time weight prep
    feats_avg = jax.random.normal(k_x, (BATCH, FEATURE_DIM), jnp.float32)

    fwd = jax.jit(functools.partial(evaluator_forward, output_dim=OUTPUT_DIM))
    probs = fwd(feats_avg, prepared)
    probs = jax.block_until_ready(probs)

    # sanity check against pure-JAX f32 reference (tolerance relaxed for bf16 matmuls)
    ref = reference_forward(feats_avg, params)
    assert probs.shape == (BATCH, OUTPUT_DIM)
    assert bool(jnp.all(jnp.isfinite(probs)))
    assert jnp.allclose(jnp.sum(probs, axis=-1), 1.0, atol=1e-5)   # exact division now
    assert jnp.allclose(probs, ref, atol=2e-2, rtol=0.0)

    # also exercise a non-multiple-of-8 batch (padding path)
    small = jax.block_until_ready(evaluator_forward(feats_avg[:2], prepared))
    assert small.shape == (2, OUTPUT_DIM)
    assert jnp.allclose(small, ref[:2], atol=2e-2, rtol=0.0)

    print("KERNEL_OK")
</pallas_src>

<mosaic_0001>
module attributes {stable_mosaic.version = 11 : i64} {
  func.func @_mlp_evaluator_kernel(%arg0: i32, %arg1: memref<8x512xf32, #tpu.memory_space<vmem>>, %arg2: memref<512x256xbf16, #tpu.memory_space<vmem>>, %arg3: memref<1x256xf32, #tpu.memory_space<vmem>>, %arg4: memref<256x128xbf16, #tpu.memory_space<vmem>>, %arg5: memref<1x128xf32, #tpu.memory_space<vmem>>, %arg6: memref<128x128xbf16, #tpu.memory_space<vmem>>, %arg7: memref<1x128xf32, #tpu.memory_space<vmem>>, %arg8: memref<8x128xf32, #tpu.memory_space<vmem>>) attributes {dimension_semantics = [#tpu.dimension_semantics<parallel>], iteration_bounds = array<i64: 1>, scalar_prefetch = 0 : i64, scratch_operands = 0 : i64, tpu.core_type = #tpu.core_type<tc>, window_params = [{transform_indices = @transform_0, window_bounds = array<i64: 8, 512>}, {pipeline_mode = #tpu.pipeline_mode<synchronous>, transform_indices = @transform_1, window_bounds = array<i64: 512, 256>}, {pipeline_mode = #tpu.pipeline_mode<synchronous>, transform_indices = @transform_2, window_bounds = array<i64: 1, 256>}, {pipeline_mode = #tpu.pipeline_mode<synchronous>, transform_indices = @transform_3, window_bounds = array<i64: 256, 128>}, {pipeline_mode = #tpu.pipeline_mode<synchronous>, transform_indices = @transform_4, window_bounds = array<i64: 1, 128>}, {pipeline_mode = #tpu.pipeline_mode<synchronous>, transform_indices = @transform_5, window_bounds = array<i64: 128, 128>}, {pipeline_mode = #tpu.pipeline_mode<synchronous>, transform_indices = @transform_6, window_bounds = array<i64: 1, 128>}, {transform_indices = @transform_7, window_bounds = array<i64: 8, 128>}]} {
    %c0 = arith.constant 0 : index
    %c0_0 = arith.constant 0 : index
    %0 = vector.load %arg1[%c0, %c0_0] : memref<8x512xf32, #tpu.memory_space<vmem>>, vector<8x512xf32>
    %1 = arith.truncf %0 : vector<8x512xf32> to vector<8x512xbf16>
    %c0_1 = arith.constant 0 : index
    %c0_2 = arith.constant 0 : index
    %2 = vector.load %arg2[%c0_1, %c0_2] : memref<512x256xbf16, #tpu.memory_space<vmem>>, vector<512x256xbf16>
    %cst = arith.constant dense<0.000000e+00> : vector<8x256xf32>
    %3 = tpu.matmul %1, %2, %cst {dimension_numbers = #tpu.dot_dimension_numbers<[1], [0], [0], [1], [0, 0, 1, 1], [], []>} : vector<8x512xbf16>, vector<512x256xbf16>, vector<8x256xf32> -> vector<8x256xf32>
    %c0_3 = arith.constant 0 : index
    %c0_4 = arith.constant 0 : index
    %4 = vector.load %arg3[%c0_3, %c0_4] : memref<1x256xf32, #tpu.memory_space<vmem>>, vector<1x256xf32>
    %5 = vector.broadcast %4 : vector<1x256xf32> to vector<8x256xf32>
    %6 = arith.addf %3, %5 : vector<8x256xf32>
    %cst_5 = arith.constant 0.000000e+00 : f32
    %7 = vector.broadcast %cst_5 : f32 to vector<8x256xf32>
    %8 = arith.maximumf %6, %7 : vector<8x256xf32>
    %9 = arith.truncf %8 : vector<8x256xf32> to vector<8x256xbf16>
    %c0_6 = arith.constant 0 : index
    %c0_7 = arith.constant 0 : index
    %10 = vector.load %arg4[%c0_6, %c0_7] : memref<256x128xbf16, #tpu.memory_space<vmem>>, vector<256x128xbf16>
    %cst_8 = arith.constant dense<0.000000e+00> : vector<8x128xf32>
    %11 = tpu.matmul %9, %10, %cst_8 {dimension_numbers = #tpu.dot_dimension_numbers<[1], [0], [0], [1], [0, 0, 1, 1], [], []>} : vector<8x256xbf16>, vector<256x128xbf16>, vector<8x128xf32> -> vector<8x128xf32>
    %c0_9 = arith.constant 0 : index
    %c0_10 = arith.constant 0 : index
    %12 = vector.load %arg5[%c0_9, %c0_10] : memref<1x128xf32, #tpu.memory_space<vmem>>, vector<1x128xf32>
    %13 = vector.broadcast %12 : vector<1x128xf32> to vector<8x128xf32>
    %14 = arith.addf %11, %13 : vector<8x128xf32>
    %cst_11 = arith.constant 0.000000e+00 : f32
    %15 = vector.broadcast %cst_11 : f32 to vector<8x128xf32>
    %16 = arith.maximumf %14, %15 : vector<8x128xf32>
    %17 = arith.truncf %16 : vector<8x128xf32> to vector<8x128xbf16>
    %c0_12 = arith.constant 0 : index
    %c0_13 = arith.constant 0 : index
    %18 = vector.load %arg6[%c0_12, %c0_13] : memref<128x128xbf16, #tpu.memory_space<vmem>>, vector<128x128xbf16>
    %cst_14 = arith.constant dense<0.000000e+00> : vector<8x128xf32>
    %19 = tpu.matmul %17, %18, %cst_14 {dimension_numbers = #tpu.dot_dimension_numbers<[1], [0], [0], [1], [0, 0, 1, 1], [], []>} : vector<8x128xbf16>, vector<128x128xbf16>, vector<8x128xf32> -> vector<8x128xf32>
    %c0_15 = arith.constant 0 : index
    %c0_16 = arith.constant 0 : index
    %20 = vector.load %arg7[%c0_15, %c0_16] : memref<1x128xf32, #tpu.memory_space<vmem>>, vector<1x128xf32>
    %21 = vector.broadcast %20 : vector<1x128xf32> to vector<8x128xf32>
    %22 = arith.addf %19, %21 : vector<8x128xf32>
    %cst_17 = arith.constant dense<0xFF800000> : vector<8xf32>
    %23 = vector.multi_reduction <maximumf>, %22, %cst_17 [1] : vector<8x128xf32> to vector<8xf32>
    %24 = vector.shape_cast %23 : vector<8xf32> to vector<8x1xf32>
    %25 = vector.broadcast %24 : vector<8x1xf32> to vector<8x128xf32>
    %26 = arith.subf %22, %25 : vector<8x128xf32>
    %27 = math.exp %26 : vector<8x128xf32>
    %cst_18 = arith.constant dense<0.000000e+00> : vector<8xf32>
    %28 = vector.multi_reduction <add>, %27, %cst_18 [1] : vector<8x128xf32> to vector<8xf32>
    %29 = vector.shape_cast %28 : vector<8xf32> to vector<8x1xf32>
    %30 = vector.broadcast %29 : vector<8x1xf32> to vector<8x128xf32>
    %31 = arith.divf %27, %30 : vector<8x128xf32>
    %c0_19 = arith.constant 0 : index
    %c0_20 = arith.constant 0 : index
    %32 = vector.load %arg8[%c0_19, %c0_20] : memref<8x128xf32, #tpu.memory_space<vmem>>, vector<8x128xf32>
    tpu.vector_store %arg8[%c0_19, %c0_20], %31 {strides = array<i32>} : memref<8x128xf32, #tpu.memory_space<vmem>>, vector<8x128xf32>,
    return
  }
  func.func @transform_0(%arg0: i32) -> (i32, i32) {
    %c0_i32 = arith.constant 0 : i32
    %c0_i32_0 = arith.constant 0 : i32
    return %arg0, %c0_i32 : i32, i32
  }
  func.func @transform_1(%arg0: i32) -> (i32, i32) {
    %c0_i32 = arith.constant 0 : i32
    %c0_i32_0 = arith.constant 0 : i32
    %c0_i32_1 = arith.constant 0 : i32
    return %c0_i32, %c0_i32_0 : i32, i32
  }
  func.func @transform_2(%arg0: i32) -> (i32, i32) {
    %c0_i32 = arith.constant 0 : i32
    %c0_i32_0 = arith.constant 0 : i32
    %c0_i32_1 = arith.constant 0 : i32
    return %c0_i32, %c0_i32_0 : i32, i32
  }
  func.func @transform_3(%arg0: i32) -> (i32, i32) {
    %c0_i32 = arith.constant 0 : i32
    %c0_i32_0 = arith.constant 0 : i32
    %c0_i32_1 = arith.constant 0 : i32
    return %c0_i32, %c0_i32_0 : i32, i32
  }
  func.func @transform_4(%arg0: i32) -> (i32, i32) {
    %c0_i32 = arith.constant 0 : i32
    %c0_i32_0 = arith.constant 0 : i32
    %c0_i32_1 = arith.constant 0 : i32
    return %c0_i32, %c0_i32_0 : i32, i32
  }
  func.func @transform_5(%arg0: i32) -> (i32, i32) {
    %c0_i32 = arith.constant 0 : i32
    %c0_i32_0 = arith.constant 0 : i32
    %c0_i32_1 = arith.constant 0 : i32
    return %c0_i32, %c0_i32_0 : i32, i32
  }
  func.func @transform_6(%arg0: i32) -> (i32, i32) {
    %c0_i32 = arith.constant 0 : i32
    %c0_i32_0 = arith.constant 0 : i32
    %c0_i32_1 = arith.constant 0 : i32
    return %c0_i32, %c0_i32_0 : i32, i32
  }
  func.func @transform_7(%arg0: i32) -> (i32, i32) {
    %c0_i32 = arith.constant 0 : i32
    %c0_i32_0 = arith.constant 0 : i32
    return %arg0, %c0_i32 : i32, i32
  }
}

</mosaic_0001>

<bundles_post_ra>
// kernel: evaluator_forward.1
= control target key start
LH: loop header
LB: loop body
LE: loop exit
PB: predicated region body
PF: predicated region fallthrough
CT: control target
= control target key end

     0   :  { %12 = vsyncpa [#allocation3], 0  ;;  %s1406_s0 = inlined_call_operand.hbm [shape: f32[8,512], index: 0, kind: input, shape index: {}]   ;;  %s1407_s1 = inlined_call_operand.hbm [shape: bf16[512,256], index: 1, kind: input, shape index: {}]   ;;  %s1408_s2 = inlined_call_operand.vmem [shape: f32[1,256], index: 2, kind: input, shape index: {}]   ;;  %s1409_s3 = inlined_call_operand.hbm [shape: bf16[256,128], index: 3, kind: input, shape index: {}]   ;;  %s1410_s4 = inlined_call_operand.vmem [shape: f32[1,128], index: 4, kind: input, shape index: {}]   ;;  %s1411_s5 = inlined_call_operand.hbm [shape: bf16[128,128], index: 5, kind: input, shape index: {}]   ;;  %s1412_s6 = inlined_call_operand.vmem [shape: f32[1,128], index: 6, kind: input, shape index: {}]   ;;  %s1413_s7 = inlined_call_operand.hbm [shape: f32[8,128], index: 7, kind: output, shape index: {}]  }
   0x1   :  { %13 = vsyncpa [#allocation6], 0 }
   0x2   :  { %14 = vsyncpa [#allocation9], 0 }
   0x3   :  { %15 = vsyncpa [#allocation4], 0  ;;  %s1286_s24 = smov [#allocation5]   ;;  %s1168_s28 = scalar_lea.hbm %s1407_s1, 8192 }
   0x4   :  { %s31_s25 = sshll.u32 %s1286_s24, 4  ;;  %p1169_p0 = scmp.ne.s32.totalorder %s1407_s1, %s1168_s28  ;;  %s32_s25 = int_to_ptr.vmem [resolvable:$true] %s31_s25 }
   0x5   :  { %p1172_p1 = scmp.lt.u32.totalorder %s1168_s28, %s1407_s1 }
   0x7   :  { %p1174_p2 = pnand %p1172_p1, %p1169_p0 }
   0x9   :  { %1177 = shalt.err (!%p1174_p2)
}
   0xa   :  { %s1178_s10 = scalar_lea.vmem %s32_s25, 8192  ;;  %p1183_p4 = scmp.lt.s32.totalorder %s32_s25, %s32_s25 }
   0xb   :  { %p1179_p3 = scmp.ne.s32.totalorder %s32_s25, %s1178_s10  ;;  %p1184_p5 = scmp.lt.s32.totalorder %s1178_s10, %s1178_s10 }
   0xd   :  { %p1185_p6 = por %p1184_p5, %p1183_p4 }
   0xf   :  { %p1186_p7 = pnand %p1185_p6, %p1179_p3 }
  0x11   :  { %1189 = shalt.err (!%p1186_p7)
}
  0x12   :  { %s1287_s11 = smov 128   ;;  %s1288_s12 = smov 8  }
  0x13   :  { %37 = dma.hbm_to_vmem [thread:$0]  %s1407_s1, 8192, %s32_s25, [#allocation6], %s1287_s11, %s1287_s11, %s1288_s12  }
  0x14   :  { %s1289_s15 = smov [#allocation2]   ;;  %s1290_s17 = smov [#allocation7]  }
  0x15   :  { %s22_s16 = sshll.u32 %s1289_s15, 4  ;;  %s45_s18 = sshll.u32 %s1290_s17, 4  ;;  %s23_s16 = int_to_ptr.vmem [resolvable:$true] %s22_s16  ;;  %s46_s18 = int_to_ptr.vmem [resolvable:$true] %s45_s18 }
  0x16   :  { %s1190_s21 = scalar_lea.hbm %s1406_s0, 512 }
  0x17   :  { %p1191_p8 = scmp.ne.s32.totalorder %s1406_s0, %s1190_s21  ;;  %p1194_p9 = scmp.lt.u32.totalorder %s1190_s21, %s1406_s0 }
  0x19   :  { %p1196_p10 = pnand %p1194_p9, %p1191_p8 }
  0x1b   :  { %1199 = shalt.err (!%p1196_p10)
}
  0x1c   :  { %s1200_s1 = scalar_lea.vmem %s23_s16, 512  ;;  %p1205_p12 = scmp.lt.s32.totalorder %s23_s16, %s23_s16 }
  0x1d   :  { %p1201_p11 = scmp.ne.s32.totalorder %s23_s16, %s1200_s1  ;;  %p1206_p13 = scmp.lt.s32.totalorder %s1200_s1, %s1200_s1 }
  0x1f   :  { %p1207_p0 = por %p1206_p13, %p1205_p12 }
  0x21   :  { %p1208_p1 = pnand %p1207_p0, %p1201_p11 }
  0x23   :  { %1211 = shalt.err (!%p1208_p1)
}
  0x24   :  { %25 = dma.hbm_to_vmem [thread:$0]  %s1406_s0, 512, %s23_s16, [#allocation3]  }
  0x25   :  { %s1212_s30 = scalar_lea.hbm %s1409_s3, 2048 }
  0x26   :  { %p1213_p2 = scmp.ne.s32.totalorder %s1409_s3, %s1212_s30  ;;  %p1216_p3 = scmp.lt.u32.totalorder %s1212_s30, %s1409_s3 }
  0x28   :  { %p1218_p4 = pnand %p1216_p3, %p1213_p2 }
  0x2a   :  { %1221 = shalt.err (!%p1218_p4)
}
  0x2b   :  { %s1222_s12 = scalar_lea.vmem %s46_s18, 2048  ;;  %p1227_p6 = scmp.lt.s32.totalorder %s46_s18, %s46_s18 }
  0x2c   :  { %p1223_p5 = scmp.ne.s32.totalorder %s46_s18, %s1222_s12  ;;  %p1228_p7 = scmp.lt.s32.totalorder %s1222_s12, %s1222_s12 }
  0x2e   :  { %p1229_p8 = por %p1228_p7, %p1227_p6 }
  0x30   :  { %p1230_p9 = pnand %p1229_p8, %p1223_p5 }
  0x32   :  { %1233 = shalt.err (!%p1230_p9)
}
  0x33   :  { %s1291_s0 = smov 64   ;;  %s1292_s13 = smov 4  }
  0x34   :  { %51 = dma.hbm_to_vmem [thread:$0]  %s1409_s3, 2048, %s46_s18, [#allocation6], %s1291_s0, %s1291_s0, %s1292_s13  }
  0x35   :  { %s1293_s16 = smov [#allocation8]   ;;  %s1234_s21 = scalar_lea.hbm %s1411_s5, 1024 }
  0x36   :  { %s59_s17 = sshll.u32 %s1293_s16, 4  ;;  %p1235_p10 = scmp.ne.s32.totalorder %s1411_s5, %s1234_s21  ;;  %s60_s17 = int_to_ptr.vmem [resolvable:$true] %s59_s17 }
  0x37   :  { %p1238_p11 = scmp.lt.u32.totalorder %s1234_s21, %s1411_s5 }
  0x39   :  { %p1240_p12 = pnand %p1238_p11, %p1235_p10 }
  0x3b   :  { %1243 = shalt.err (!%p1240_p12)
}
  0x3c   :  { %s1244_s1 = scalar_lea.vmem %s60_s17, 1024  ;;  %p1249_p0 = scmp.lt.s32.totalorder %s60_s17, %s60_s17 }
  0x3d   :  { %p1245_p13 = scmp.ne.s32.totalorder %s60_s17, %s1244_s1  ;;  %p1250_p1 = scmp.lt.s32.totalorder %s1244_s1, %s1244_s1 }
  0x3f   :  { %p1251_p2 = por %p1250_p1, %p1249_p0 }
  0x41   :  { %p1252_p3 = pnand %p1251_p2, %p1245_p13 }
  0x43   :  { %1255 = shalt.err (!%p1252_p3)
}
  0x44   :  { %65 = dma.hbm_to_vmem [thread:$0]  %s1411_s5, 1024, %s60_s17, [#allocation9], %s1291_s0, %s1291_s0, %s1292_s13  }
  0x45   :  { %1278 = dma.done.wait [#allocation3], 512  }
  0x46   :  { %1279 = vsyncadd [#allocation3], 4294966784 }
  0x47   :  { %1280 = dma.done.wait [#allocation6], 10240  }
  0x48   :  { %1281 = vsyncadd [#allocation6], 4294957056 }
  0x49   :  { %1282 = dma.done.wait [#allocation9], 1024  }
  0x4a   :  { %1283 = vsyncadd [#allocation9], 4294966272  ;;  %v1044_v0 = vld [vmem:[#allocation5 + $0x4] ss:$8 sps:$4 sm:$0xff]   ;;  %v1046_v1 = vld [vmem:[#allocation5] ss:$8 sps:$4 sm:$0xff]  }
  0x4b   :  { %485 = vmatprep.subr.bf16.mxu0 %v1044_v0  ;;  %v1047_v2 = vld [vmem:[#allocation5 + $0x14] ss:$8 sps:$4 sm:$0xff]   ;;  %v1049_v3 = vld [vmem:[#allocation5 + $0x10] ss:$8 sps:$4 sm:$0xff]   ;;  %v1050_v4 = vld [vmem:[#allocation5 + $0x24] ss:$8 sps:$4 sm:$0xff]  }
  0x4c   :  { %486 = vmatpush1.bf16.msra.mxu0 %v1046_v1  ;;  %v1052_v5 = vld [vmem:[#allocation5 + $0x20] ss:$8 sps:$4 sm:$0xff]   ;;  %v1053_v6 = vld [vmem:[#allocation5 + $0x34] ss:$8 sps:$4 sm:$0xff]   ;;  %v1055_v7 = vld [vmem:[#allocation5 + $0x30] ss:$8 sps:$4 sm:$0xff]  }
  0x4d   :  { %487 = vmatprep.subr.bf16.mxu0 %v1047_v2  ;;  %v1056_v8 = vld [vmem:[#allocation5 + $0x44] ss:$8 sps:$4 sm:$0xff]   ;;  %v1058_v9 = vld [vmem:[#allocation5 + $0x40] ss:$8 sps:$4 sm:$0xff]   ;;  %v1059_v10 = vld [vmem:[#allocation5 + $0x54] ss:$8 sps:$4 sm:$0xff]  }
  0x4e   :  { %v1061_v11 = vld [vmem:[#allocation5 + $0x50] ss:$8 sps:$4 sm:$0xff]   ;;  %v1062_v12 = vld [vmem:[#allocation5 + $0x64] ss:$8 sps:$4 sm:$0xff]   ;;  %v1064_v15 = vld [vmem:[#allocation5 + $0x60] ss:$8 sps:$4 sm:$0xff]  }
  0x4f   :  { %v82_v13 = vld [vmem:[#allocation2 + $0x8] sm:$0xff]  ;;  %v1065_v16 = vld [vmem:[#allocation5 + $0x74] ss:$8 sps:$4 sm:$0xff]   ;;  %v1067_v17 = vld [vmem:[#allocation5 + $0x70] ss:$8 sps:$4 sm:$0xff]   ;;  %vm1295_vm0 = vmmov 0  }
  0x50   :  { %488 = vmatpush1.bf16.msra.mxu0 %v1049_v3  ;;  %v86_v14 = vpack.c.bf16 %v82_v13, %v82_v13  ;;  %v1068_v18 = vld [vmem:[#allocation5 + $0x84] ss:$8 sps:$4 sm:$0xff]   ;;  %v1070_v19 = vld [vmem:[#allocation5 + $0x80] ss:$8 sps:$4 sm:$0xff]   ;;  %v1071_v20 = vld [vmem:[#allocation5 + $0x94] ss:$8 sps:$4 sm:$0xff]  }
  0x51   :  { %489 = vmatprep.subr.bf16.mxu0 %v1050_v4  ;;  %v1073_v21 = vld [vmem:[#allocation5 + $0x90] ss:$8 sps:$4 sm:$0xff]   ;;  %v1074_v22 = vld [vmem:[#allocation5 + $0xa4] ss:$8 sps:$4 sm:$0xff]   ;;  %v1076_v23 = vld [vmem:[#allocation5 + $0xa0] ss:$8 sps:$4 sm:$0xff]  }
  0x52   :  { %517 = vmatprep.mubr.bf16.mxu0 %v86_v14  ;;  %v1077_v24 = vld [vmem:[#allocation5 + $0xb4] ss:$8 sps:$4 sm:$0xff]   ;;  %v1079_v25 = vld [vmem:[#allocation5 + $0xb0] ss:$8 sps:$4 sm:$0xff]   ;;  %v1080_v26 = vld [vmem:[#allocation5 + $0xc4] ss:$8 sps:$4 sm:$0xff]  }
  0x53   :  { %v1140_v27 = vld [vmem:[#allocation7 + $0x40] sm:$0xff]   ;;  %v1083_v30 = vld [vmem:[#allocation5 + $0xd4] ss:$8 sps:$4 sm:$0xff]   ;;  %v1142_v31 = vld [vmem:[#allocation7 + $0x48] sm:$0xff]  }
  0x54   :  { %490 = vmatpush1.bf16.msra.mxu0 %v1052_v5  ;;  %v1082_v28 = vld [vmem:[#allocation5 + $0xc0] ss:$8 sps:$4 sm:$0xff]   ;;  %976 = vmatprep.subr.bf16.mxu1 %v1140_v27  ;;  %v1144_v33 = vld [vmem:[#allocation7 + $0x50] sm:$0xff]   ;;  %v1086_v35 = vld [vmem:[#allocation5 + $0xe4] ss:$8 sps:$4 sm:$0xff]  }
  0x55   :  { %491 = vmatprep.subr.bf16.mxu0 %v1053_v6  ;;  %v1141_v29 = vld [vmem:[#allocation7] sm:$0xff]   ;;  %v1143_v32 = vld [vmem:[#allocation7 + $0x8] sm:$0xff]   ;;  %v1085_v34 = vld [vmem:[#allocation5 + $0xd0] ss:$8 sps:$4 sm:$0xff]  }
  0x56   :  { %977 = vmatpush3.bf16.msra.mxu1 %v1141_v29  ;;  %v1145_v36 = vld [vmem:[#allocation7 + $0x10] sm:$0xff]   ;;  %v1146_v37 = vld [vmem:[#allocation7 + $0x58] sm:$0xff]   ;;  %v1088_v38 = vld [vmem:[#allocation5 + $0xe0] ss:$8 sps:$4 sm:$0xff]  }
  0x57   :  { %978 = vmatprep.subr.bf16.mxu1 %v1142_v31  ;;  %v1089_v39 = vld [vmem:[#allocation5 + $0xf4] ss:$8 sps:$4 sm:$0xff]   ;;  %v1148_v41 = vld [vmem:[#allocation7 + $0x60] sm:$0xff]   ;;  %v1091_v42 = vld [vmem:[#allocation5 + $0xf0] ss:$8 sps:$4 sm:$0xff]  }
  0x58   :  { %492 = vmatpush1.bf16.msra.mxu0 %v1055_v7  ;;  %v1147_v40 = vld [vmem:[#allocation7 + $0x18] sm:$0xff]   ;;  %v81_v43 = vld [vmem:[#allocation2] sm:$0xff]  ;;  %v1150_v47 = vld [vmem:[#allocation7 + $0x68] sm:$0xff]  }
  0x59   :  { %493 = vmatprep.subr.bf16.mxu0 %v1056_v8  ;;  %v1149_v44 = vld [vmem:[#allocation7 + $0x20] sm:$0xff]   ;;  %v84_v46 = vld [vmem:[#allocation2 + $0x18] sm:$0xff]  ;;  %v85_v49 = vpack.c.bf16 %v81_v43, %v81_v43  ;;  %v1151_v52 = vld [vmem:[#allocation7 + $0x28] sm:$0xff]  }
  0x5a   :  { %979 = vmatpush3.bf16.msra.mxu1 %v1143_v32  ;;  %v1094_v45 = vld [vmem:[#allocation5 + $0x104] ss:$8 sps:$4 sm:$0xff]   ;;  %v1092_v48 = vld [vmem:[#allocation5 + $0x100] ss:$8 sps:$4 sm:$0xff]   ;;  %v88_v50 = vpack.c.bf16 %v84_v46, %v84_v46  ;;  %v1097_v51 = vld [vmem:[#allocation5 + $0x114] ss:$8 sps:$4 sm:$0xff]  }
  0x5b   :  { %980 = vmatprep.subr.bf16.mxu1 %v1144_v33  ;;  %v1095_v53 = vld [vmem:[#allocation5 + $0x110] ss:$8 sps:$4 sm:$0xff]   ;;  %v1100_v54 = vld [vmem:[#allocation5 + $0x124] ss:$8 sps:$4 sm:$0xff]   ;;  %v1098_v55 = vld [vmem:[#allocation5 + $0x120] ss:$8 sps:$4 sm:$0xff]  }
  0x5c   :  { %494 = vmatpush1.bf16.msra.mxu0 %v1058_v9  ;;  %v1103_v56 = vld [vmem:[#allocation5 + $0x134] ss:$8 sps:$4 sm:$0xff]   ;;  %v1101_v57 = vld [vmem:[#allocation5 + $0x130] ss:$8 sps:$4 sm:$0xff]   ;;  %v1106_v58 = vld [vmem:[#allocation5 + $0x144] ss:$8 sps:$4 sm:$0xff]  }
  0x5d   :  { %495 = vmatprep.subr.bf16.mxu0 %v1059_v10  ;;  %v1104_v59 = vld [vmem:[#allocation5 + $0x140] ss:$8 sps:$4 sm:$0xff]   ;;  %v1109_v60 = vld [vmem:[#allocation5 + $0x154] ss:$8 sps:$4 sm:$0xff]   ;;  %v1107_v61 = vld [vmem:[#allocation5 + $0x150] ss:$8 sps:$4 sm:$0xff]  }
  0x5e   :  { %981 = vmatpush3.bf16.msra.mxu1 %v1145_v36  ;;  %v1112_v62 = vld [vmem:[#allocation5 + $0x164] ss:$8 sps:$4 sm:$0xff]   ;;  %v1110_v63 = vld [vmem:[#allocation5 + $0x160] ss:$8 sps:$4 sm:$0xff]   ;;  %v1115_v0 = vld [vmem:[#allocation5 + $0x174] ss:$8 sps:$4 sm:$0xff]  }
  0x5f   :  { %982 = vmatprep.subr.bf16.mxu1 %v1146_v37  ;;  %v1113_v1 = vld [vmem:[#allocation5 + $0x170] ss:$8 sps:$4 sm:$0xff]   ;;  %v1118_v2 = vld [vmem:[#allocation5 + $0x184] ss:$8 sps:$4 sm:$0xff]   ;;  %v1116_v3 = vld [vmem:[#allocation5 + $0x180] ss:$8 sps:$4 sm:$0xff]  }
  0x60   :  { %496 = vmatpush1.bf16.msra.mxu0 %v1061_v11  ;;  %v1121_v4 = vld [vmem:[#allocation5 + $0x194] ss:$8 sps:$4 sm:$0xff]   ;;  %v1119_v5 = vld [vmem:[#allocation5 + $0x190] ss:$8 sps:$4 sm:$0xff]   ;;  %v1124_v6 = vld [vmem:[#allocation5 + $0x1a4] ss:$8 sps:$4 sm:$0xff]  }
  0x61   :  { %497 = vmatprep.subr.bf16.mxu0 %v1062_v12  ;;  %v1122_v7 = vld [vmem:[#allocation5 + $0x1a0] ss:$8 sps:$4 sm:$0xff]   ;;  %v1127_v8 = vld [vmem:[#allocation5 + $0x1b4] ss:$8 sps:$4 sm:$0xff]   ;;  %v1125_v9 = vld [vmem:[#allocation5 + $0x1b0] ss:$8 sps:$4 sm:$0xff]  }
  0x62   :  { %983 = vmatpush3.bf16.msra.mxu1 %v1147_v40  ;;  %v1130_v10 = vld [vmem:[#allocation5 + $0x1c4] ss:$8 sps:$4 sm:$0xff]   ;;  %v1128_v11 = vld [vmem:[#allocation5 + $0x1c0] ss:$8 sps:$4 sm:$0xff]   ;;  %v1133_v12 = vld [vmem:[#allocation5 + $0x1d4] ss:$8 sps:$4 sm:$0xff]  }
  0x63   :  { %984 = vmatprep.subr.bf16.mxu1 %v1148_v41  ;;  %v1131_v13 = vld [vmem:[#allocation5 + $0x1d0] ss:$8 sps:$4 sm:$0xff]   ;;  %v1136_v14 = vld [vmem:[#allocation5 + $0x1e4] ss:$8 sps:$4 sm:$0xff]  }
  0x64   :  { %498 = vmatpush1.bf16.msra.mxu0 %v1064_v15  ;;  %v1134_v15 = vld [vmem:[#allocation5 + $0x1e0] ss:$8 sps:$4 sm:$0xff]  }
  0x65   :  { %499 = vmatprep.subr.bf16.mxu0 %v1065_v16  ;;  %v1139_v16 = vld [vmem:[#allocation5 + $0x1f4] ss:$8 sps:$4 sm:$0xff]   ;;  %v1156_v41 = vld [vmem:[#allocation8] sm:$0xff]   ;;  %v1157_v43 = vld [vmem:[#allocation8 + $0x8] sm:$0xff]  }
  0x66   :  { %985 = vmatpush3.bf16.msra.mxu1 %v1149_v44  ;;  %v1158_v44 = vld [vmem:[#allocation8 + $0x10] sm:$0xff]   ;;  %v1160_v46 = vld [vmem:[#allocation8 + $0x20] sm:$0xff]  }
  0x67   :  { %986 = vmatprep.subr.bf16.mxu1 %v1150_v47  ;;  %v1161_v47 = vld [vmem:[#allocation8 + $0x28] sm:$0xff]  }
  0x68   :  { %500 = vmatpush1.bf16.msra.mxu0 %v1067_v17  ;;  %v1137_v17 = vld [vmem:[#allocation5 + $0x1f0] ss:$8 sps:$4 sm:$0xff]  }
  0x69   :  { %501 = vmatprep.subr.bf16.mxu0 %v1068_v18  ;;  %v83_v18 = vld [vmem:[#allocation2 + $0x10] sm:$0xff] }
  0x6a   :  { %987 = vmatpush3.bf16.msra.mxu1 %v1151_v52 }
  0x6c   :  { %502 = vmatpush1.bf16.msra.mxu0 %v1070_v19  ;;  %v87_v19 = vpack.c.bf16 %v83_v18, %v83_v18 }
  0x6d   :  { %503 = vmatprep.subr.bf16.mxu0 %v1071_v20  ;;  %v1152_v20 = vld [vmem:[#allocation7 + $0x70] sm:$0xff]  }
  0x6e   :  { %988 = vmatprep.subr.bf16.mxu1 %v1152_v20 }
  0x70   :  { %504 = vmatpush1.bf16.msra.mxu0 %v1073_v21  ;;  %v1153_v21 = vld [vmem:[#allocation7 + $0x30] sm:$0xff]  }
  0x71   :  { %505 = vmatprep.subr.bf16.mxu0 %v1074_v22  ;;  %989 = vmatpush3.bf16.msra.mxu1 %v1153_v21  ;;  %v1154_v22 = vld [vmem:[#allocation7 + $0x78] sm:$0xff]  }
  0x72   :  { %990 = vmatprep.subr.bf16.mxu1 %v1154_v22 }
  0x74   :  { %506 = vmatpush1.bf16.msra.mxu0 %v1076_v23  ;;  %v1155_v23 = vld [vmem:[#allocation7 + $0x38] sm:$0xff]  }
  0x75   :  { %507 = vmatprep.subr.bf16.mxu0 %v1077_v24  ;;  %991 = vmatpush3.bf16.msra.mxu1 %v1155_v23  ;;  %v1294_v24 = vmov 0.0  }
  0x76   :  { %1007 = vmatprep.subr.bf16.mxu1 %v1294_v24 }
  0x78   :  { %508 = vmatpush1.bf16.msra.mxu0 %v1079_v25  ;;  %v155_v25 = vlaneseq }
  0x79   :  { %509 = vmatprep.subr.bf16.mxu0 %v1080_v26 }
  0x7a   :  { %v156_v26 = vshrl.u32 %v155_v25, 7 }
  0x7c   :  { %510 = vmatpush1.bf16.msra.mxu0 %v1082_v28  ;;  %v157_v27 = vsub.s32 0, %v156_v26  ;;  %v153_v28 = vld [vmem:[%s1408_s2] sm:$0x3]  ;;  %v161_v29 = vsub.s32 1, %v156_v26 }
  0x7d   :  { %511 = vmatprep.subr.bf16.mxu0 %v1083_v30 }
  0x7e   :  { %v158_v30 = vrot.slane %v153_v28, %v157_v27  ;;  %v162_v31 = vrot.slane %v153_v28, %v161_v29 }
  0x80   :  { %512 = vmatpush1.bf16.msra.mxu0 %v1085_v34 }
  0x81   :  { %513 = vmatprep.subr.bf16.mxu0 %v1086_v35 }
  0x84   :  { %514 = vmatpush1.bf16.msra.mxu0 %v1088_v38 }
  0x85   :  { %515 = vmatprep.subr.bf16.mxu0 %v1089_v39 }
  0x88   :  { %516 = vmatpush1.bf16.msra.mxu0 %v1091_v42 }
  0x89   :  { %526 = vmatprep.subr.bf16.mxu0 %v1094_v45  ;;  %v1159_v45 = vld [vmem:[#allocation8 + $0x18] sm:$0xff]  }
  0x8b   :  { %518 = vmatmul.mubr.bf16.vlgmr.msra.gmra.mrb[0].mxu0 %v85_v49  ;;  %v1163_v49 = vld [vmem:[#allocation8 + $0x38] sm:$0xff]  }
  0x8c   :  { %527 = vmatpush1.bf16.msra.mxu0 %v1092_v48  ;;  %558 = vmatprep.mubr.bf16.mxu0 %v88_v50  ;;  %v1162_v48 = vld [vmem:[#allocation8 + $0x30] sm:$0xff]  }
  0x8d   :  { %528 = vmatprep.subr.bf16.mxu0 %v1097_v51  ;;  %v950_v51 = vld [vmem:[%s1410_s4] ss:$0 sm:$0xff]  ;;  %s1296_s4 = smov [#allocation10]  }
  0x8e   :  { %s875_s30 = sshll.u32 %s1296_s4, 4  ;;  %s876_s30 = int_to_ptr.vmem [resolvable:$true] %s875_s30 }
  0x8f   :  { %p1261_p5 = scmp.lt.s32.totalorder %s876_s30, %s876_s30 }
  0x90   :  { %529 = vmatpush1.bf16.msra.mxu0 %v1095_v53 }
  0x91   :  { %530 = vmatprep.subr.bf16.mxu0 %v1100_v54 }
  0x94   :  { %531 = vmatpush1.bf16.msra.mxu0 %v1098_v55 }
  0x95   :  { %532 = vmatprep.subr.bf16.mxu0 %v1103_v56 }
  0x98   :  { %533 = vmatpush1.bf16.msra.mxu0 %v1101_v57 }
  0x99   :  { %534 = vmatprep.subr.bf16.mxu0 %v1106_v58 }
  0x9c   :  { %535 = vmatpush1.bf16.msra.mxu0 %v1104_v59  ;;  %v967_v59 = vld [vmem:[%s1412_s6] ss:$0 sm:$0xff]  ;;  %s1256_s6 = scalar_lea.vmem %s876_s30, 128 }
  0x9d   :  { %536 = vmatprep.subr.bf16.mxu0 %v1109_v60  ;;  %p1257_p4 = scmp.ne.s32.totalorder %s876_s30, %s1256_s6  ;;  %p1262_p6 = scmp.lt.s32.totalorder %s1256_s6, %s1256_s6 }
  0x9f   :  { %p1263_p7 = por %p1262_p6, %p1261_p5 }
  0xa0   :  { %537 = vmatpush1.bf16.msra.mxu0 %v1107_v61 }
  0xa1   :  { %538 = vmatprep.subr.bf16.mxu0 %v1112_v62  ;;  %p1264_p8 = pnand %p1263_p7, %p1257_p4 }
  0xa4   :  { %539 = vmatpush1.bf16.msra.mxu0 %v1110_v63 }
  0xa5   :  { %540 = vmatprep.subr.bf16.mxu0 %v1115_v0 }
  0xa8   :  { %541 = vmatpush1.bf16.msra.mxu0 %v1113_v1 }
  0xa9   :  { %542 = vmatprep.subr.bf16.mxu0 %v1118_v2 }
  0xac   :  { %543 = vmatpush1.bf16.msra.mxu0 %v1116_v3 }
  0xad   :  { %544 = vmatprep.subr.bf16.mxu0 %v1121_v4 }
  0xb0   :  { %545 = vmatpush1.bf16.msra.mxu0 %v1119_v5 }
  0xb1   :  { %546 = vmatprep.subr.bf16.mxu0 %v1124_v6 }
  0xb4   :  { %547 = vmatpush1.bf16.msra.mxu0 %v1122_v7 }
  0xb5   :  { %548 = vmatprep.subr.bf16.mxu0 %v1127_v8 }
  0xb8   :  { %549 = vmatpush1.bf16.msra.mxu0 %v1125_v9 }
  0xb9   :  { %550 = vmatprep.subr.bf16.mxu0 %v1130_v10 }
  0xbc   :  { %551 = vmatpush1.bf16.msra.mxu0 %v1128_v11 }
  0xbd   :  { %552 = vmatprep.subr.bf16.mxu0 %v1133_v12 }
  0xc0   :  { %553 = vmatpush1.bf16.msra.mxu0 %v1131_v13 }
  0xc1   :  { %554 = vmatprep.subr.bf16.mxu0 %v1136_v14 }
  0xc4   :  { %555 = vmatpush1.bf16.msra.mxu0 %v1134_v15 }
  0xc5   :  { %556 = vmatprep.subr.bf16.mxu0 %v1139_v16 }
  0xc8   :  { %557 = vmatpush1.bf16.msra.mxu0 %v1137_v17 }
  0xcb   :  { %559 = vmatmul.mubr.bf16.vlgmr.msra.gmra.mrb[0].mxu0 %v87_v19 }
 0x19e   :  { %v560_v32 = vpop.f32.mrb[0].mxu0 }
 0x19f   :  { %v1027_v33 = vadd.f32 %v560_v32, %v158_v30  ;;  %v562_v34 = vpop.f32.mrb[1].mxu0 }
 0x1a0   :  { %v1028_v35 = vadd.f32 %v562_v34, %v162_v31  ;;  %v564_v36 = vpop.f32.mrb[2].mxu0 }
 0x1a1   :  { %v567_v37 = vmax.f32 %v1027_v33, 0.0  ;;  %v565_v38 = vpop.f32.mrb[3].mxu0 }
 0x1a2   :  { %v568_v39 = vmax.f32 %v1028_v35, 0.0 }
 0x1a3   :  { %v569_v42 = vpack.c.bf16 %v567_v37, %v567_v37 }
 0x1a4   :  { %v570_v40 = vpack.c.bf16 %v568_v39, %v568_v39 }
 0x1a6   :  { %738 = vmatprep.mubr.bf16.mxu1 %v570_v40 }
 0x1a7   :  { %739 = vmatmul.mubr.bf16.vlgmr.msra.gmra.mrb[0].mxu1 %v569_v42 }
 0x1a8   :  { %1008 = vmatpush3.bf16.msra.mxu1 %v1156_v41  ;;  %1023 = vmatprep.mubr.msk.bf16.mxu1 %vm1295_vm0, %v1294_v24 }
 0x1a9   :  { %1009 = vmatprep.subr.bf16.mxu1 %v1294_v24 }
 0x1ac   :  { %1010 = vmatpush3.bf16.msra.mxu1 %v1157_v43 }
 0x1ad   :  { %1011 = vmatprep.subr.bf16.mxu1 %v1294_v24 }
 0x1b0   :  { %1012 = vmatpush3.bf16.msra.mxu1 %v1158_v44 }
 0x1b1   :  { %1013 = vmatprep.subr.bf16.mxu1 %v1294_v24 }
 0x1b4   :  { %1014 = vmatpush3.bf16.msra.mxu1 %v1159_v45 }
 0x1b5   :  { %1015 = vmatprep.subr.bf16.mxu1 %v1294_v24 }
 0x1b8   :  { %1016 = vmatpush3.bf16.msra.mxu1 %v1160_v46 }
 0x1b9   :  { %1017 = vmatprep.subr.bf16.mxu1 %v1294_v24 }
 0x1bc   :  { %1018 = vmatpush3.bf16.msra.mxu1 %v1161_v47 }
 0x1bd   :  { %1019 = vmatprep.subr.bf16.mxu1 %v1294_v24 }
 0x1c0   :  { %1020 = vmatpush3.bf16.msra.mxu1 %v1162_v48 }
 0x1c1   :  { %1021 = vmatprep.subr.bf16.mxu1 %v1294_v24 }
 0x1c4   :  { %1022 = vmatpush3.bf16.msra.mxu1 %v1163_v49 }
 0x27a   :  { %v992_v50 = vpop.f32.mrb[0].mxu1 }
 0x27b   :  { %v993_v52 = vpop.f32.mrb[1].mxu1 }
 0x27c   :  { %v994_v53 = vadd.f32 %v993_v52, %v992_v50  ;;  %v995_v54 = vpop.f32.mrb[2].mxu1 }
 0x27d   :  { %v996_v55 = vpop.f32.mrb[3].mxu1 }
 0x27e   :  { %v741_v56 = vadd.f32 %v994_v53, %v950_v51 }
 0x280   :  { %v746_v57 = vmax.f32 %v741_v56, 0.0 }
 0x282   :  { %v747_v58 = vpack.c.bf16 %v746_v57, %v746_v57 }
 0x284   :  { %1024 = vmatmul.mubr.bf16.vlgmr.msra.gmra.mrb[4].mxu1 %v747_v58 }
 0x357   :  { %v853_v60 = vpop.f32.mrb[4].mxu1 }
 0x358   :  { %v854_v61 = vadd.f32 %v967_v59, %v853_v60  ;;  %v1025_v62 = vpop.f32.mrb[5].mxu1 }
 0x359   :  { %v856_v63 = vpop.f32.mrb[6].mxu1 }
 0x35a   :  { %859 = vmax.xlane.f32.xlu0 %v854_v61  ;;  %v1026_v0 = vpop.f32.mrb[7].mxu1 }
 0x3e7   :  { %v860_v1 = vpop.xlane.xlu0 %859 }
 0x3e8   :  { %v861_v2 = vsub.f32 %v854_v61, %v860_v1 }
 0x3ea   :  { %v862_v3 = vmul.f32 1.442695, %v861_v2 }
 0x3ec   :  { %1164 = vpow2.f32 %v862_v3 }
 0x3f6   :  { %v1165_v4 = vpop.eup %1164 }
 0x3f7   :  { %864 = vadd.xlane.f32.xlu0 %v1165_v4 }
 0x484   :  { %v865_v5 = vpop.xlane.xlu0 %864 }
 0x485   :  { %1166 = vrcp.f32 %v865_v5 }
 0x48f   :  { %v1167_v6 = vpop.eup %1166 }
 0x490   :  { %v867_v7 = vmul.f32 %v1167_v6, %v1165_v4 }
 0x492   :  { %868 = vst [vmem:[#allocation10] sm:$0xff] %v867_v7 }
 0x493   :  { %1267 = shalt.err (!%p1264_p8)
}
 0x494   :  { %s1268_s10 = scalar_lea.hbm %s1413_s7, 128 }
 0x495   :  { %p1269_p9 = scmp.ne.s32.totalorder %s1413_s7, %s1268_s10  ;;  %p1272_p10 = scmp.lt.u32.totalorder %s1268_s10, %s1413_s7 }
 0x497   :  { %p1274_p11 = pnand %p1272_p10, %p1269_p9 }
 0x499   :  { %1277 = shalt.err (!%p1274_p11)
}
 0x49a   :  { %878 = dma.vmem_to_hbm [thread:$0]  %s876_s30, 128, %s1413_s7, [#allocation4]  }
 0x49b   :  { %1284 = dma.done.wait [#allocation4], 128  }
 0x49c   :  { %1285 = vsyncadd [#allocation4], 4294967168 }
 0x49d   :  { %882 = vsyncpa [#allocation3], 1 }
 0x49e   :  { %883 = vsyncpa [#allocation6], 1 }
 0x49f   :  { %884 = vsyncpa [#allocation9], 1 }
 0x4a0   :  { %885 = vsyncpa [#allocation4], 1 }

</bundles_post_ra>
